<compile_context>
chip_gen: v7x
topology: tpu7x:2x2x1
jax: 0.10.0
libtpu: 0.0.40
codegen_flags: <defaults>
</compile_context>

<pallas_src>
import jax
import jax.numpy as jnp
from jax.experimental import pallas as pl
from jax.experimental.pallas import tpu as pltpu


def _round_up(x, m):
    return ((x + m - 1) // m) * m


def baseline_dnn_kernel(emb_ref, len_ref, w1m_ref, w1x_ref, b1_ref, w2_ref,
                        b2_ref, out_ref):
    # One batch tile [TB, S, D] per grid step.  Pooling stays in f32; only the
    # MXU inputs are cast to the matmul dtype (bf16).
    emb = emb_ref[...].astype(jnp.float32)          # [TB, S, D]
    lens_i = len_ref[...]                           # [TB, 1] int32
    tb, seq, dim = emb.shape

    # Mean pooling: sum over the FULL sequence, divide by the true length
    # (exactly the PyTorch loop).  Divide via EUP reciprocal + multiply.
    inv_len = pl.reciprocal(lens_i.astype(jnp.float32), approx=True)   # [TB,1]
    mean_pooled = jnp.sum(emb, axis=1) * inv_len                        # [TB,D]

    # Max pooling over only the first `length` tokens.  int32 [TB,S,1] mask,
    # turned into a 0 / -inf additive mask and lane-broadcast over D
    # (no full [TB,S,D] f32 iota / mask).
    pos = jax.lax.broadcasted_iota(jnp.int32, (tb, seq, 1), 1)          # [TB,S,1]
    neg_mask = jnp.where(pos < lens_i[:, :, None], 0.0, -jnp.inf)       # [TB,S,1]
    max_pooled = jnp.max(emb + neg_mask, axis=1)                        # [TB,D]

    mm_dtype = w1m_ref.dtype
    # concat([mean, max]) @ W1  ==  mean @ W1_mean + max @ W1_max  (no concat).
    h = (
        jnp.dot(mean_pooled.astype(mm_dtype), w1m_ref[...],
                preferred_element_type=jnp.float32)
        + jnp.dot(max_pooled.astype(mm_dtype), w1x_ref[...],
                  preferred_element_type=jnp.float32)
        + b1_ref[...]
    )
    h = jnp.maximum(h, 0.0)                                             # [TB,Hp]

    # Lane-dense (Cp = multiple of 128) full-width store.
    out_ref[...] = (
        jnp.dot(h.astype(mm_dtype), w2_ref[...],
                preferred_element_type=jnp.float32)
        + b2_ref[...]
    )


def prepare_params(emb_table, w1, b1, w2, b2, matmul_dtype=jnp.bfloat16):
    """One-time parameter preparation (NOT in the per-call path):
       embedding table stored bf16; weights pre-transposed to [in, out],
       zero-padded to lane multiples of 128, W1 split into mean/max halves,
       cast to the MXU dtype.  Biases stay f32."""
    D = emb_table.shape[1]
    H, two_d = w1.shape
    C = w2.shape[0]
    assert two_d == 2 * D
    Hp = _round_up(H, 128)            # 1000 -> 1024
    Cp = _round_up(C, 128)            # 4    -> 128

    w1_t = jnp.pad(jnp.transpose(w1).astype(jnp.float32), ((0, 0), (0, Hp - H)))
    w2_t = jnp.pad(jnp.transpose(w2).astype(jnp.float32),
                   ((0, Hp - H), (0, Cp - C)))
    return {
        "emb_table": emb_table.astype(jnp.bfloat16),       # [V, D] bf16
        "w1_mean": w1_t[:D].astype(matmul_dtype),          # [D, Hp]
        "w1_max": w1_t[D:].astype(matmul_dtype),           # [D, Hp]
        "b1": jnp.pad(b1.astype(jnp.float32), (0, Hp - H)).reshape(1, Hp),
        "w2": w2_t.astype(matmul_dtype),                   # [Hp, Cp]
        "b2": jnp.pad(b2.astype(jnp.float32), (0, Cp - C)).reshape(1, Cp),
        "num_classes": C,
    }


def baseline_dnn_forward(x_ids, lengths, params, block_b=128):
    """x_ids: [B, S] int32 token ids, lengths: [B] int32.  Returns [B, C] f32."""
    B, S = x_ids.shape
    D = params["emb_table"].shape[1]
    Hp = params["w1_mean"].shape[1]
    Cp = params["w2"].shape[1]
    C = params["num_classes"]

    # TODO(synk): fuse this gather into the kernel (manual DMA gather on the
    # HBM table) instead of materializing [B, S, D] in HBM; bf16 storage at
    # least halves the HBM bytes of the gathered activations.
    emb = jnp.take(params["emb_table"], x_ids, axis=0)          # [B, S, D] bf16

    # Batch tile: up to 128 rows (fills the MXU M dim when B allows and gives
    # DMA/compute overlap).  Pad B to a multiple of the tile; padded rows use
    # length 1 and zero embeddings so no NaN/inf leaks (they are sliced off).
    tb = min(block_b, _round_up(B, 8))
    bp = _round_up(B, tb)
    emb = jnp.pad(emb, ((0, bp - B), (0, 0), (0, 0)))
    lens = jnp.pad(lengths.astype(jnp.int32), (0, bp - B), constant_values=1)
    lens = lens.reshape(bp, 1)

    out = pl.pallas_call(
        baseline_dnn_kernel,
        out_shape=jax.ShapeDtypeStruct((bp, Cp), jnp.float32),
        grid_spec=pltpu.PrefetchScalarGridSpec(
            num_scalar_prefetch=0,
            grid=(bp // tb,),
            in_specs=[
                pl.BlockSpec((tb, S, D), lambda i: (i, 0, 0)),   # emb batch tile
                pl.BlockSpec((tb, 1), lambda i: (i, 0)),         # lengths tile
                pl.BlockSpec((D, Hp), lambda i: (0, 0)),         # W1 mean half (resident)
                pl.BlockSpec((D, Hp), lambda i: (0, 0)),         # W1 max half  (resident)
                pl.BlockSpec((1, Hp), lambda i: (0, 0)),         # b1           (resident)
                pl.BlockSpec((Hp, Cp), lambda i: (0, 0)),        # W2           (resident)
                pl.BlockSpec((1, Cp), lambda i: (0, 0)),         # b2           (resident)
            ],
            out_specs=pl.BlockSpec((tb, Cp), lambda i: (i, 0)),  # lane-dense logits
        ),
        compiler_params=pltpu.CompilerParams(
            dimension_semantics=("parallel",),                   # megacore / 2-TC
            vmem_limit_bytes=32 * 1024 * 1024,                   # safe on v5e/v6e/v7x
        ),
    )(emb, lens, params["w1_mean"], params["w1_max"], params["b1"],
      params["w2"], params["b2"])
    return out[:B, :C]


def reference_forward(x_ids, lengths, emb_table, w1, b1, w2, b2,
                      matmul_dtype=jnp.float32):
    """Plain-JAX reference of the PyTorch forward.  With matmul_dtype=f32 and
    an f32 table it is exact; pass a bf16 table / matmul_dtype=bf16 to mirror
    the kernel's reduced-precision storage and MXU-input casts (accumulation is
    f32 either way)."""
    emb = jnp.take(emb_table, x_ids, axis=0).astype(jnp.float32)   # [B, S, D]
    lens_f = lengths.astype(jnp.float32)[:, None]
    mean_pooled = jnp.sum(emb, axis=1) / lens_f
    S = emb.shape[1]
    mask = jnp.arange(S, dtype=jnp.int32)[None, :, None] < lengths[:, None, None]
    max_pooled = jnp.max(jnp.where(mask, emb, -jnp.inf), axis=1)
    rep = jnp.concatenate([mean_pooled, max_pooled], axis=1)
    h = jnp.dot(rep.astype(matmul_dtype), w1.T.astype(matmul_dtype),
                preferred_element_type=jnp.float32) + b1
    h = jnp.maximum(h, 0.0)
    return jnp.dot(h.astype(matmul_dtype), w2.T.astype(matmul_dtype),
                   preferred_element_type=jnp.float32) + b2


if __name__ == "__main__":
    key = jax.random.PRNGKey(0)
    k_emb, k_w1, k_b1, k_w2, k_b2, k_x, k_len = jax.random.split(key, 7)

    # Small shapes consistent with the module.
    vocab, dim = 100, 32          # pretrained embedding table [100, 32]
    hidden = 1000                 # nn.Linear(2*dim, 1000)
    output_size = 4
    batch, seq = 4, 8

    emb_table = jax.random.normal(k_emb, (vocab, dim), dtype=jnp.float32)
    w1 = jax.random.normal(k_w1, (hidden, 2 * dim), dtype=jnp.float32) * 0.05
    b1 = jax.random.normal(k_b1, (hidden,), dtype=jnp.float32) * 0.05
    w2 = jax.random.normal(k_w2, (output_size, hidden), dtype=jnp.float32) * 0.05
    b2 = jax.random.normal(k_b2, (output_size,), dtype=jnp.float32) * 0.05

    x_ids = jax.random.randint(k_x, (batch, seq), 0, vocab, dtype=jnp.int32)
    lengths = jax.random.randint(k_len, (batch,), 1, seq + 1, dtype=jnp.int32)

    params = prepare_params(emb_table, w1, b1, w2, b2)   # one-time prep
    logits = baseline_dnn_forward(x_ids, lengths, params)
    logits = jax.block_until_ready(logits)
    assert logits.shape == (batch, output_size)

    # Reference with the same parameter storage / MXU-input precision (bf16
    # table, bf16 matmul inputs, f32 accumulation); residual differences are
    # the approximate reciprocal and accumulation order.
    ref = reference_forward(x_ids, lengths, params["emb_table"], w1, b1, w2, b2,
                            matmul_dtype=jnp.bfloat16)
    assert jnp.allclose(logits, ref, atol=1e-2, rtol=1e-2), (
        float(jnp.max(jnp.abs(logits - ref))))

    print("KERNEL_OK")
</pallas_src>

<mosaic_0001>
module attributes {stable_mosaic.version = 11 : i64} {
  func.func @baseline_dnn_kernel(%arg0: i32, %arg1: memref<8x8x32xbf16, #tpu.memory_space<vmem>>, %arg2: memref<8x1xi32, #tpu.memory_space<vmem>>, %arg3: memref<32x1024xbf16, #tpu.memory_space<vmem>>, %arg4: memref<32x1024xbf16, #tpu.memory_space<vmem>>, %arg5: memref<1x1024xf32, #tpu.memory_space<vmem>>, %arg6: memref<1024x128xbf16, #tpu.memory_space<vmem>>, %arg7: memref<1x128xf32, #tpu.memory_space<vmem>>, %arg8: memref<8x128xf32, #tpu.memory_space<vmem>>) attributes {dimension_semantics = [#tpu.dimension_semantics<parallel>], iteration_bounds = array<i64: 1>, scalar_prefetch = 0 : i64, scratch_operands = 0 : i64, tpu.core_type = #tpu.core_type<tc>, window_params = [{transform_indices = @transform_0, window_bounds = array<i64: 8, 8, 32>}, {transform_indices = @transform_1, window_bounds = array<i64: 8, 1>}, {pipeline_mode = #tpu.pipeline_mode<synchronous>, transform_indices = @transform_2, window_bounds = array<i64: 32, 1024>}, {pipeline_mode = #tpu.pipeline_mode<synchronous>, transform_indices = @transform_3, window_bounds = array<i64: 32, 1024>}, {pipeline_mode = #tpu.pipeline_mode<synchronous>, transform_indices = @transform_4, window_bounds = array<i64: 1, 1024>}, {pipeline_mode = #tpu.pipeline_mode<synchronous>, transform_indices = @transform_5, window_bounds = array<i64: 1024, 128>}, {pipeline_mode = #tpu.pipeline_mode<synchronous>, transform_indices = @transform_6, window_bounds = array<i64: 1, 128>}, {transform_indices = @transform_7, window_bounds = array<i64: 8, 128>}]} {
    %c0 = arith.constant 0 : index
    %c0_0 = arith.constant 0 : index
    %c0_1 = arith.constant 0 : index
    %0 = vector.load %arg1[%c0, %c0_0, %c0_1] : memref<8x8x32xbf16, #tpu.memory_space<vmem>>, vector<8x8x32xbf16>
    %1 = arith.extf %0 : vector<8x8x32xbf16> to vector<8x8x32xf32>
    %c0_2 = arith.constant 0 : index
    %c0_3 = arith.constant 0 : index
    %2 = vector.load %arg2[%c0_2, %c0_3] : memref<8x1xi32, #tpu.memory_space<vmem>>, vector<8x1xi32>
    %3 = arith.sitofp %2 : vector<8x1xi32> to vector<8x1xf32>
    %4 = tpu.reciprocal %3 {approx = true} : vector<8x1xf32> -> vector<8x1xf32>
    %cst = arith.constant dense<0.000000e+00> : vector<8x32xf32>
    %5 = vector.multi_reduction <add>, %1, %cst [1] : vector<8x8x32xf32> to vector<8x32xf32>
    %6 = vector.broadcast %4 : vector<8x1xf32> to vector<8x32xf32>
    %7 = arith.mulf %5, %6 : vector<8x32xf32>
    %8 = tpu.iota {dimensions = array<i32: 1>} : vector<8x8x1xi32>
    %9 = vector.shape_cast %2 : vector<8x1xi32> to vector<8x1x1xi32>
    %10 = vector.broadcast %9 : vector<8x1x1xi32> to vector<8x8x1xi32>
    %11 = arith.cmpi slt, %8, %10 : vector<8x8x1xi32>
    %cst_4 = arith.constant 0.000000e+00 : f32
    %cst_5 = arith.constant 0xFF800000 : f32
    %12 = vector.broadcast %cst_4 : f32 to vector<8x8x1xf32>
    %13 = vector.broadcast %cst_5 : f32 to vector<8x8x1xf32>
    %14 = arith.select %11, %12, %13 : vector<8x8x1xi1>, vector<8x8x1xf32>
    %15 = vector.broadcast %14 : vector<8x8x1xf32> to vector<8x8x32xf32>
    %16 = arith.addf %1, %15 : vector<8x8x32xf32>
    %cst_6 = arith.constant dense<0xFF800000> : vector<8x32xf32>
    %17 = vector.multi_reduction <maximumf>, %16, %cst_6 [1] : vector<8x8x32xf32> to vector<8x32xf32>
    %18 = arith.truncf %7 : vector<8x32xf32> to vector<8x32xbf16>
    %c0_7 = arith.constant 0 : index
    %c0_8 = arith.constant 0 : index
    %19 = vector.load %arg3[%c0_7, %c0_8] : memref<32x1024xbf16, #tpu.memory_space<vmem>>, vector<32x1024xbf16>
    %cst_9 = arith.constant dense<0.000000e+00> : vector<8x1024xf32>
    %20 = tpu.matmul %18, %19, %cst_9 {dimension_numbers = #tpu.dot_dimension_numbers<[1], [0], [0], [1], [0, 0, 1, 1], [], []>} : vector<8x32xbf16>, vector<32x1024xbf16>, vector<8x1024xf32> -> vector<8x1024xf32>
    %21 = arith.truncf %17 : vector<8x32xf32> to vector<8x32xbf16>
    %c0_10 = arith.constant 0 : index
    %c0_11 = arith.constant 0 : index
    %22 = vector.load %arg4[%c0_10, %c0_11] : memref<32x1024xbf16, #tpu.memory_space<vmem>>, vector<32x1024xbf16>
    %cst_12 = arith.constant dense<0.000000e+00> : vector<8x1024xf32>
    %23 = tpu.matmul %21, %22, %cst_12 {dimension_numbers = #tpu.dot_dimension_numbers<[1], [0], [0], [1], [0, 0, 1, 1], [], []>} : vector<8x32xbf16>, vector<32x1024xbf16>, vector<8x1024xf32> -> vector<8x1024xf32>
    %24 = arith.addf %20, %23 : vector<8x1024xf32>
    %c0_13 = arith.constant 0 : index
    %c0_14 = arith.constant 0 : index
    %25 = vector.load %arg5[%c0_13, %c0_14] : memref<1x1024xf32, #tpu.memory_space<vmem>>, vector<1x1024xf32>
    %26 = vector.broadcast %25 : vector<1x1024xf32> to vector<8x1024xf32>
    %27 = arith.addf %24, %26 : vector<8x1024xf32>
    %cst_15 = arith.constant 0.000000e+00 : f32
    %28 = vector.broadcast %cst_15 : f32 to vector<8x1024xf32>
    %29 = arith.maximumf %27, %28 : vector<8x1024xf32>
    %30 = arith.truncf %29 : vector<8x1024xf32> to vector<8x1024xbf16>
    %c0_16 = arith.constant 0 : index
    %c0_17 = arith.constant 0 : index
    %31 = vector.load %arg6[%c0_16, %c0_17] : memref<1024x128xbf16, #tpu.memory_space<vmem>>, vector<1024x128xbf16>
    %cst_18 = arith.constant dense<0.000000e+00> : vector<8x128xf32>
    %32 = tpu.matmul %30, %31, %cst_18 {dimension_numbers = #tpu.dot_dimension_numbers<[1], [0], [0], [1], [0, 0, 1, 1], [], []>} : vector<8x1024xbf16>, vector<1024x128xbf16>, vector<8x128xf32> -> vector<8x128xf32>
    %c0_19 = arith.constant 0 : index
    %c0_20 = arith.constant 0 : index
    %33 = vector.load %arg7[%c0_19, %c0_20] : memref<1x128xf32, #tpu.memory_space<vmem>>, vector<1x128xf32>
    %34 = vector.broadcast %33 : vector<1x128xf32> to vector<8x128xf32>
    %35 = arith.addf %32, %34 : vector<8x128xf32>
    %c0_21 = arith.constant 0 : index
    %c0_22 = arith.constant 0 : index
    %36 = vector.load %arg8[%c0_21, %c0_22] : memref<8x128xf32, #tpu.memory_space<vmem>>, vector<8x128xf32>
    tpu.vector_store %arg8[%c0_21, %c0_22], %35 {strides = array<i32>} : memref<8x128xf32, #tpu.memory_space<vmem>>, vector<8x128xf32>,
    return
  }
  func.func @transform_0(%arg0: i32) -> (i32, i32, i32) {
    %c0_i32 = arith.constant 0 : i32
    %c0_i32_0 = arith.constant 0 : i32
    %c0_i32_1 = arith.constant 0 : i32
    return %arg0, %c0_i32, %c0_i32_0 : i32, i32, i32
  }
  func.func @transform_1(%arg0: i32) -> (i32, i32) {
    %c0_i32 = arith.constant 0 : i32
    %c0_i32_0 = arith.constant 0 : i32
    return %arg0, %c0_i32 : i32, i32
  }
  func.func @transform_2(%arg0: i32) -> (i32, i32) {
    %c0_i32 = arith.constant 0 : i32
    %c0_i32_0 = arith.constant 0 : i32
    %c0_i32_1 = arith.constant 0 : i32
    return %c0_i32, %c0_i32_0 : i32, i32
  }
  func.func @transform_3(%arg0: i32) -> (i32, i32) {
    %c0_i32 = arith.constant 0 : i32
    %c0_i32_0 = arith.constant 0 : i32
    %c0_i32_1 = arith.constant 0 : i32
    return %c0_i32, %c0_i32_0 : i32, i32
  }
  func.func @transform_4(%arg0: i32) -> (i32, i32) {
    %c0_i32 = arith.constant 0 : i32
    %c0_i32_0 = arith.constant 0 : i32
    %c0_i32_1 = arith.constant 0 : i32
    return %c0_i32, %c0_i32_0 : i32, i32
  }
  func.func @transform_5(%arg0: i32) -> (i32, i32) {
    %c0_i32 = arith.constant 0 : i32
    %c0_i32_0 = arith.constant 0 : i32
    %c0_i32_1 = arith.constant 0 : i32
    return %c0_i32, %c0_i32_0 : i32, i32
  }
  func.func @transform_6(%arg0: i32) -> (i32, i32) {
    %c0_i32 = arith.constant 0 : i32
    %c0_i32_0 = arith.constant 0 : i32
    %c0_i32_1 = arith.constant 0 : i32
    return %c0_i32, %c0_i32_0 : i32, i32
  }
  func.func @transform_7(%arg0: i32) -> (i32, i32) {
    %c0_i32 = arith.constant 0 : i32
    %c0_i32_0 = arith.constant 0 : i32
    return %arg0, %c0_i32 : i32, i32
  }
}

</mosaic_0001>

<bundles_post_ra>
// kernel: tpu_custom_call.1
= control target key start
LH: loop header
LB: loop body
LE: loop exit
PB: predicated region body
PF: predicated region fallthrough
CT: control target
= control target key end

     0   :  { %12 = vsyncpa [#allocation3], 0  ;;  %s2535_s0 = inlined_call_operand.hbm [shape: bf16[8,8,32], index: 0, kind: input, shape index: {}]   ;;  %s2536_s1 = inlined_call_operand.vmem [shape: s32[8,1], index: 1, kind: input, shape index: {}]   ;;  %s2537_s2 = inlined_call_operand.hbm [shape: bf16[32,1024], index: 2, kind: input, shape index: {}]   ;;  %s2538_s3 = inlined_call_operand.hbm [shape: bf16[32,1024], index: 3, kind: input, shape index: {}]   ;;  %s2539_s4 = inlined_call_operand.vmem [shape: f32[1,1024], index: 4, kind: input, shape index: {}]   ;;  %s2540_s5 = inlined_call_operand.hbm [shape: bf16[1024,128], index: 5, kind: input, shape index: {}]   ;;  %s2541_s6 = inlined_call_operand.vmem [shape: f32[1,128], index: 6, kind: input, shape index: {}]   ;;  %s2542_s7 = inlined_call_operand.hbm [shape: f32[8,128], index: 7, kind: output, shape index: {}]  }
   0x1   :  { %13 = vsyncpa [#allocation6], 0 }
   0x2   :  { %14 = vsyncpa [#allocation9], 0 }
   0x3   :  { %15 = vsyncpa [#allocation4], 0  ;;  %s2195_s24 = smov [#allocation5]   ;;  %s2077_s28 = scalar_lea.hbm %s2537_s2, 2048 }
   0x4   :  { %s35_s25 = sshll.u32 %s2195_s24, 4  ;;  %p2078_p0 = scmp.ne.s32.totalorder %s2537_s2, %s2077_s28  ;;  %s36_s25 = int_to_ptr.vmem [resolvable:$true] %s35_s25 }
   0x5   :  { %p2081_p1 = scmp.lt.u32.totalorder %s2077_s28, %s2537_s2 }
   0x7   :  { %p2083_p2 = pnand %p2081_p1, %p2078_p0 }
   0x9   :  { %2086 = shalt.err (!%p2083_p2)
}
   0xa   :  { %s2087_s10 = scalar_lea.vmem %s36_s25, 2048  ;;  %p2092_p4 = scmp.lt.s32.totalorder %s36_s25, %s36_s25 }
   0xb   :  { %p2088_p3 = scmp.ne.s32.totalorder %s36_s25, %s2087_s10  ;;  %p2093_p5 = scmp.lt.s32.totalorder %s2087_s10, %s2087_s10 }
   0xd   :  { %p2094_p6 = por %p2093_p5, %p2092_p4 }
   0xf   :  { %p2095_p7 = pnand %p2094_p6, %p2088_p3 }
  0x11   :  { %2098 = shalt.err (!%p2095_p7)
}
  0x12   :  { %s2196_s11 = smov 512   ;;  %s2197_s12 = smov 32  }
  0x13   :  { %41 = dma.hbm_to_vmem [thread:$0]  %s2537_s2, 2048, %s36_s25, [#allocation6], %s2196_s11, %s2196_s11, %s2197_s12  }
  0x14   :  { %s2198_s15 = smov [#allocation2]   ;;  %s2099_s19 = scalar_lea.hbm %s2535_s0, 512 }
  0x15   :  { %s21_s16 = sshll.u32 %s2198_s15, 4  ;;  %p2100_p8 = scmp.ne.s32.totalorder %s2535_s0, %s2099_s19  ;;  %s22_s16 = int_to_ptr.vmem [resolvable:$true] %s21_s16 }
  0x16   :  { %p2103_p9 = scmp.lt.u32.totalorder %s2099_s19, %s2535_s0 }
  0x18   :  { %p2105_p10 = pnand %p2103_p9, %p2100_p8 }
  0x1a   :  { %2108 = shalt.err (!%p2105_p10)
}
  0x1b   :  { %s2109_s24 = scalar_lea.vmem %s22_s16, 512  ;;  %p2114_p12 = scmp.lt.s32.totalorder %s22_s16, %s22_s16 }
  0x1c   :  { %p2110_p11 = scmp.ne.s32.totalorder %s22_s16, %s2109_s24  ;;  %p2115_p13 = scmp.lt.s32.totalorder %s2109_s24, %s2109_s24 }
  0x1e   :  { %p2116_p0 = por %p2115_p13, %p2114_p12 }
  0x20   :  { %p2117_p1 = pnand %p2116_p0, %p2110_p11 }
  0x22   :  { %2120 = shalt.err (!%p2117_p1)
}
  0x23   :  { %s2199_s2 = smov 64   ;;  %s2200_s25 = smov 4  }
  0x24   :  { %27 = dma.hbm_to_vmem [thread:$0]  %s2535_s0, 512, %s22_s16, [#allocation3], %s2199_s2, %s2199_s2, %s2200_s25  }
  0x25   :  { %s2201_s28 = smov [#allocation7]   ;;  %s2202_s30 = smov [#allocation8]  }
  0x26   :  { %s47_s29 = sshll.u32 %s2201_s28, 4  ;;  %s61_s8 = sshll.u32 %s2202_s30, 4  ;;  %s48_s29 = int_to_ptr.vmem [resolvable:$true] %s47_s29  ;;  %s2277_s8 = int_to_ptr.vmem [resolvable:$true] %s61_s8 }
  0x27   :  { %s2121_s13 = scalar_lea.hbm %s2538_s3, 2048 }
  0x28   :  { %p2122_p2 = scmp.ne.s32.totalorder %s2538_s3, %s2121_s13  ;;  %p2125_p3 = scmp.lt.u32.totalorder %s2121_s13, %s2538_s3 }
  0x2a   :  { %p2127_p4 = pnand %p2125_p3, %p2122_p2 }
  0x2c   :  { %2130 = shalt.err (!%p2127_p4)
}
  0x2d   :  { %s2131_s0 = scalar_lea.vmem %s48_s29, 2048  ;;  %p2136_p6 = scmp.lt.s32.totalorder %s48_s29, %s48_s29 }
  0x2e   :  { %p2132_p5 = scmp.ne.s32.totalorder %s48_s29, %s2131_s0  ;;  %p2137_p7 = scmp.lt.s32.totalorder %s2131_s0, %s2131_s0 }
  0x30   :  { %p2138_p8 = por %p2137_p7, %p2136_p6 }
  0x32   :  { %p2139_p9 = pnand %p2138_p8, %p2132_p5 }
  0x34   :  { %2142 = shalt.err (!%p2139_p9)
}
  0x35   :  { %53 = dma.hbm_to_vmem [thread:$0]  %s2538_s3, 2048, %s48_s29, [#allocation6], %s2196_s11, %s2196_s11, %s2197_s12  }
  0x36   :  { %s2143_s22 = scalar_lea.hbm %s2540_s5, 8192 }
  0x37   :  { %p2144_p10 = scmp.ne.s32.totalorder %s2540_s5, %s2143_s22  ;;  %p2147_p11 = scmp.lt.u32.totalorder %s2143_s22, %s2540_s5 }
  0x39   :  { %p2149_p12 = pnand %p2147_p11, %p2144_p10 }
  0x3b   :  { %2152 = shalt.err (!%p2149_p12)
}
  0x3c   :  { %s2153_s28 = scalar_lea.vmem %s2277_s8, 8192  ;;  %p2158_p0 = scmp.lt.s32.totalorder %s2277_s8, %s2277_s8 }
  0x3d   :  { %p2154_p13 = scmp.ne.s32.totalorder %s2277_s8, %s2153_s28  ;;  %p2159_p1 = scmp.lt.s32.totalorder %s2153_s28, %s2153_s28 }
  0x3f   :  { %p2160_p2 = por %p2159_p1, %p2158_p0 }
  0x41   :  { %p2161_p3 = pnand %p2160_p2, %p2154_p13 }
  0x43   :  { %2164 = shalt.err (!%p2161_p3)
}
  0x44   :  { %67 = dma.hbm_to_vmem [thread:$0]  %s2540_s5, 8192, %s2277_s8, [#allocation9], %s2199_s2, %s2199_s2, %s2200_s25  }
  0x45   :  { %2187 = dma.done.wait [#allocation3], 512  }
  0x46   :  { %2188 = vsyncadd [#allocation3], 4294966784 }
  0x47   :  { %2189 = dma.done.wait [#allocation6], 4096  }
  0x48   :  { %2190 = vsyncadd [#allocation6], 4294963200 }
  0x49   :  { %2191 = dma.done.wait [#allocation9], 8192  }
  0x4a   :  { %2192 = vsyncadd [#allocation9], 4294959104  ;;  %v186_v0 = vlaneseq  ;;  %v2203_v1 = vmov 0   ;;  %v2204_v2 = vmov 1966171168   ;;  %v99_v7 = vld [vmem:[%s2536_s1] sm:$0xff] }
  0x4b   :  { %1980 = vset.pattern.permute.xlu0 %v2203_v1  ;;  %v190_v3 = vunpack.c.l.s4 %v2204_v2  ;;  %1991 = vset.pattern.permute.xlu1 %v2203_v1  ;;  %v188_v10 = vcombine.high %v99_v7, %v99_v7  ;;  %v100_v11 = vcvt.s32.f32 %v99_v7  ;;  %v2205_v23 = vmov -inf   ;;  %v421_v45 = vld [vmem:[#allocation7] sm:$0xff]  ;;  %v422_v47 = vld [vmem:[#allocation7 + $0x8] sm:$0xff]  ;;  %v2343_v58 = vld [vmem:[#allocation7 + $0x10] sm:$0xff] }
  0x4c   :  { %v2316_v4 = vshrl.u32 %v186_v0, 7  ;;  %583 = vmatprep.mubr.bf16.mxu0 %v2203_v1  ;;  %624 = vmatprep.mubr.bf16.mxu1 %v2203_v1  ;;  %v425_v46 = vld [vmem:[#allocation7 + $0x20] sm:$0xff]  ;;  %v426_v50 = vld [vmem:[#allocation7 + $0x28] sm:$0xff]  ;;  %v2345_v60 = vld [vmem:[#allocation7 + $0x30] sm:$0xff]  ;;  %vm102_vm8 = vcmask 261120   ;;  %vm453_vm9 = vcmask 1041409  }
  0x4d   :  { %v191_v5 = vunpack.c.0.s8 %v190_v3  ;;  %2067 = vrcp.f32 %v100_v11  ;;  %v1757_v48 = vcombine.high %v421_v45, %v425_v46  ;;  %v1756_v49 = vcombine.low %v421_v45, %v425_v46  ;;  %v429_v51 = vld [vmem:[#allocation7 + $0x40] sm:$0xff]  ;;  %v430_v56 = vld [vmem:[#allocation7 + $0x48] sm:$0xff]  ;;  %v2347_v61 = vld [vmem:[#allocation7 + $0x18] sm:$0xff] }
  0x4e   :  { %v2325_v8 = vsub.s32 0, %v2316_v4  ;;  %v433_v52 = vld [vmem:[#allocation7 + $0x60] sm:$0xff]  ;;  %v1759_v53 = vcombine.high %v422_v47, %v426_v50  ;;  %v1758_v54 = vcombine.low %v422_v47, %v426_v50  ;;  %v434_v57 = vld [vmem:[#allocation7 + $0x68] sm:$0xff]  ;;  %v2349_v62 = vld [vmem:[#allocation7 + $0x38] sm:$0xff]  ;;  %v1760_v0 = vcombine.low %v2343_v58, %v2345_v60 }
  0x4f   :  { %v194_v6 = vsub.s32 %v191_v5, %v2316_v4  ;;  %v1765_v55 = vcombine.high %v429_v51, %v433_v52  ;;  %551 = vmatprep.subr.bf16.mxu0 %v1757_v48  ;;  %v1767_v59 = vcombine.high %v430_v56, %v434_v57  ;;  %v1764_v63 = vcombine.low %v429_v51, %v433_v52 }
  0x50   :  { %552 = vmatpush1.bf16.msra.mxu0 %v1756_v49  ;;  %592 = vmatprep.subr.bf16.mxu1 %v1759_v53  ;;  %v1762_v2 = vcombine.low %v2347_v61, %v2349_v62  ;;  %v1766_v3 = vcombine.low %v430_v56, %v434_v57  ;;  %v1761_v5 = vcombine.high %v2343_v58, %v2345_v60  ;;  %vm455_vm10 = vcmask 1042434   ;;  %v409_v58 = vld [vmem:[#allocation5 + $0x60] sm:$0xff]  ;;  %v406_v60 = vld [vmem:[#allocation5 + $0x48] sm:$0xff] }
  0x51   :  { %v195_v9 = vrot.slane %v99_v7, %v194_v6  ;;  %v202_v14 = vrot.slane %v188_v10, %v194_v6  ;;  %593 = vmatpush1.bf16.msra.mxu1 %v1758_v54  ;;  %553 = vmatprep.subr.bf16.mxu0 %v1765_v55  ;;  %v2359_v7 = vld [vmem:[#allocation2] sm:$0xff]   ;;  %v2363_v10 = vld [vmem:[#allocation2 + $0x8] sm:$0xff]   ;;  %vm457_vm11 = vcmask 1043459   ;;  %vm459_vm12 = vcmask 1044484  }
  0x52   :  { %594 = vmatprep.subr.bf16.mxu1 %v1767_v59  ;;  %v1863_v11 = vunpack.c.l.bf16 %v2359_v7  ;;  %vm461_vm13 = vcmask 1045509   ;;  %vm463_vm14 = vcmask 1046534   ;;  %vm465_vm15 = vcmask 1047559  }
  0x53   :  { %v203_v12 = vcombine.high %v195_v9, %v195_v9  ;;  %v211_v13 = vrot.slane %v195_v9, %v194_v6  ;;  %v204_v18 = vcombine.high %v202_v14, %v202_v14  ;;  %v218_v19 = vrot.slane %v202_v14, %v194_v6  ;;  %v2361_v9 = vld [vmem:[#allocation2 + $0x10] sm:$0xff]  }
  0x54   :  { %554 = vmatpush1.bf16.msra.mxu0 %v1764_v63  ;;  %v1872_v14 = vunpack.c.h.bf16 %v2361_v9 }
  0x55   :  { %v225_v15 = vrot.slane %v203_v12, %v194_v6  ;;  %v233_v16 = vcombine.high %v211_v13, %v211_v13  ;;  %v240_v17 = vrot.slane %v211_v13, %v2325_v8  ;;  %v232_v22 = vrot.slane %v204_v18, %v194_v6  ;;  %595 = vmatpush1.bf16.msra.mxu1 %v1766_v3 }
  0x56   :  { %v234_v25 = vcombine.high %v218_v19, %v218_v19  ;;  %v256_v26 = vrot.slane %v218_v19, %v2325_v8  ;;  %v1763_v6 = vcombine.high %v2347_v61, %v2349_v62  ;;  %633 = vmatprep.subr.bf16.mxu0 %v1761_v5  ;;  %v1864_v12 = vunpack.c.h.bf16 %v2359_v7  ;;  %v410_v61 = vld [vmem:[#allocation5 + $0x68] sm:$0xff] }
  0x57   :  { %v244_v20 = vrot.slane %v225_v15, %v2325_v8  ;;  %vm269_vm0 = vcmp.lt.s32.totalorder %v2316_v4, %v240_v17  ;;  %v235_v21 = vcombine.high %v225_v15, %v225_v15  ;;  %v248_v27 = vrot.slane %v233_v16, %v2325_v8  ;;  %v2068_v43 = vpop.eup %2067  ;;  %v2370_v16 = vld [vmem:[#allocation2 + $0x18] sm:$0xff]  }
  0x58   :  { %v277_v24 = vsel %vm269_vm0, 0.0, %v2205_v23  ;;  %v260_v28 = vrot.slane %v232_v22, %v2325_v8  ;;  %v236_v29 = vcombine.high %v232_v22, %v232_v22  ;;  %vm273_vm2 = vcmp.lt.s32.totalorder %v2316_v4, %v256_v26  ;;  %674 = vmatprep.subr.bf16.mxu1 %v1763_v6 }
  0x59   :  { %vm270_vm1 = vcmp.lt.s32.totalorder %v2316_v4, %v244_v20  ;;  %v252_v30 = vrot.slane %v235_v21, %v2325_v8  ;;  %vm271_vm3 = vcmp.lt.s32.totalorder %v2316_v4, %v248_v27  ;;  %v264_v32 = vrot.slane %v234_v25, %v2325_v8 }
  0x5a   :  { %v278_v31 = vsel %vm270_vm1, 0.0, %v2205_v23  ;;  %vm274_vm4 = vcmp.lt.s32.totalorder %v2316_v4, %v260_v28  ;;  %v281_v34 = vsel %vm273_vm2, 0.0, %v2205_v23  ;;  %v279_v36 = vsel %vm271_vm3, 0.0, %v2205_v23 }
  0x5b   :  { %v1981_v33 = vpack.i.bf16 %v278_v31, %v277_v24  ;;  %vm272_vm5 = vcmp.lt.s32.totalorder %v2316_v4, %v252_v30  ;;  %v282_v35 = vsel %vm274_vm4, 0.0, %v2205_v23  ;;  %v268_v38 = vrot.slane %v236_v29, %v2325_v8 }
  0x5c   :  { %v280_v37 = vsel %vm272_vm5, 0.0, %v2205_v23  ;;  %v1992_v39 = vpack.i.bf16 %v282_v35, %v281_v34  ;;  %vm275_vm6 = vcmp.lt.s32.totalorder %v2316_v4, %v264_v32  ;;  %v1871_v13 = vunpack.c.l.bf16 %v2361_v9 }
  0x5d   :  { %1982 = vperm.xlu0 %1980, %v1981_v33   ;;  %v1986_v40 = vpack.i.bf16 %v280_v37, %v279_v36  ;;  %vm276_vm7 = vcmp.lt.s32.totalorder %v2316_v4, %v268_v38  ;;  %v283_v41 = vsel %vm275_vm6, 0.0, %v2205_v23  ;;  %v1867_v15 = vunpack.c.l.bf16 %v2363_v10 }
  0x5e   :  { %1993 = vperm.xlu1 %1991, %v1992_v39   ;;  %v284_v42 = vsel %vm276_vm7, 0.0, %v2205_v23  ;;  %v103_v17 = vsel %vm102_vm8, %v1863_v11, 0.0  ;;  %v110_v18 = vsel %vm102_vm8, %v1864_v12, 0.0  ;;  %v131_v19 = vsel %vm102_vm8, %v1871_v13, 0.0 }
  0x5f   :  { %v1997_v44 = vpack.i.bf16 %v284_v42, %v283_v41  ;;  %v138_v20 = vsel %vm102_vm8, %v1872_v14, 0.0  ;;  %v1868_v21 = vunpack.c.h.bf16 %v2363_v10  ;;  %v117_v22 = vsel %vm102_vm8, %v1867_v15, 0.0 }
  0x60   :  { %v1875_v23 = vunpack.c.l.bf16 %v2370_v16  ;;  %v1876_v24 = vunpack.c.h.bf16 %v2370_v16  ;;  %v104_v25 = vrot.slane %v103_v17, 4  ;;  %v111_v26 = vrot.slane %v110_v18, 4 }
  0x61   :  { %1987 = vperm.xlu0 %1980, %v1986_v40   ;;  %v132_v27 = vrot.slane %v131_v19, 4  ;;  %v139_v28 = vrot.slane %v138_v20, 4  ;;  %v118_v29 = vrot.slane %v117_v22, 4  ;;  %v124_v30 = vsel %vm102_vm8, %v1868_v21, 0.0 }
  0x62   :  { %1998 = vperm.xlu1 %1991, %v1997_v44   ;;  %v145_v31 = vsel %vm102_vm8, %v1875_v23, 0.0  ;;  %v152_v32 = vsel %vm102_vm8, %v1876_v24, 0.0  ;;  %v105_v33 = vadd.f32 %v104_v25, %v103_v17  ;;  %v112_v34 = vadd.f32 %v111_v26, %v110_v18 }
  0x63   :  { %v133_v35 = vadd.f32 %v132_v27, %v131_v19  ;;  %v140_v36 = vadd.f32 %v139_v28, %v138_v20  ;;  %v119_v37 = vadd.f32 %v118_v29, %v117_v22  ;;  %v125_v38 = vrot.slane %v124_v30, 4 }
  0x64   :  { %v146_v39 = vrot.slane %v145_v31, 4  ;;  %v153_v40 = vrot.slane %v152_v32, 4  ;;  %v106_v41 = vrot.slane %v105_v33, 2  ;;  %v113_v42 = vrot.slane %v112_v34, 2 }
  0x65   :  { %161 = vperm.xlu0 %1980, %v2068_v43   ;;  %v134_v43 = vrot.slane %v133_v35, 2  ;;  %v141_v44 = vrot.slane %v140_v36, 2  ;;  %v120_v45 = vrot.slane %v119_v37, 2  ;;  %v126_v46 = vadd.f32 %v125_v38, %v124_v30 }
  0x66   :  { %v147_v47 = vadd.f32 %v146_v39, %v145_v31  ;;  %v154_v48 = vadd.f32 %v153_v40, %v152_v32  ;;  %v107_v49 = vadd.f32 %v106_v41, %v105_v33  ;;  %v114_v50 = vadd.f32 %v113_v42, %v112_v34 }
  0x67   :  { %v135_v51 = vadd.f32 %v134_v43, %v133_v35  ;;  %v142_v52 = vadd.f32 %v141_v44, %v140_v36  ;;  %v121_v53 = vadd.f32 %v120_v45, %v119_v37  ;;  %v127_v54 = vrot.slane %v126_v46, 2 }
  0x68   :  { %v148_v55 = vrot.slane %v147_v47, 2  ;;  %v155_v56 = vrot.slane %v154_v48, 2  ;;  %v108_v57 = vrot.slane %v107_v49, 1  ;;  %v115_v59 = vrot.slane %v114_v50, 1 }
  0x69   :  { %v136_v63 = vrot.slane %v135_v51, 1  ;;  %v143_v3 = vrot.slane %v142_v52, 1  ;;  %v122_v6 = vrot.slane %v121_v53, 1  ;;  %v2395_v7 = vadd.f32 %v127_v54, %v126_v46 }
  0x6a   :  { %v2397_v17 = vadd.f32 %v148_v55, %v147_v47  ;;  %v2399_v18 = vadd.f32 %v155_v56, %v154_v48  ;;  %v2401_v19 = vadd.f32 %v108_v57, %v107_v49  ;;  %v2403_v20 = vadd.f32 %v115_v59, %v114_v50 }
  0x6b   :  { %v2405_v25 = vadd.f32 %v136_v63, %v135_v51  ;;  %v2407_v26 = vadd.f32 %v143_v3, %v142_v52  ;;  %v2409_v30 = vadd.f32 %v122_v6, %v121_v53  ;;  %v129_v31 = vrot.slane %v2395_v7, 1 }
  0x6c   :  { %v150_v32 = vrot.slane %v2397_v17, 1  ;;  %v157_v33 = vrot.slane %v2399_v18, 1 }
  0xdc   :  { %v1983_v5 = vpop.permute.xlu0 %1982 }
  0xdd   :  { %v1994_v22 = vpop.permute.xlu1 %1993  ;;  %v2069_v27 = vadd.low.f32.bf16 %v1863_v11, %v1983_v5  ;;  %v2070_v28 = vadd.high.f32.bf16 %v1864_v12, %v1983_v5 }
  0xde   :  { %v2071_v36 = vadd.low.f32.bf16 %v1871_v13, %v1994_v22  ;;  %v2072_v11 = vadd.high.f32.bf16 %v1872_v14, %v1994_v22 }
  0xdf   :  { %v333_v34 = vsel %vm102_vm8, %v2069_v27, -inf  ;;  %v340_v35 = vsel %vm102_vm8, %v2070_v28, -inf }
  0xe0   :  { %v1988_v29 = vpop.permute.xlu0 %1987  ;;  %v334_v12 = vrot.slane %v333_v34, 4  ;;  %v341_v37 = vrot.slane %v340_v35, 4  ;;  %v361_v39 = vsel %vm102_vm8, %v2071_v36, -inf  ;;  %v368_v40 = vsel %vm102_vm8, %v2072_v11, -inf }
  0xe1   :  { %v1999_v38 = vpop.permute.xlu1 %1998  ;;  %v362_v43 = vrot.slane %v361_v39, 4  ;;  %v369_v44 = vrot.slane %v368_v40, 4  ;;  %v2073_v45 = vadd.low.f32.bf16 %v1867_v15, %v1988_v29  ;;  %v2074_v13 = vadd.high.f32.bf16 %v1868_v21, %v1988_v29 }
  0xe2   :  { %v335_v41 = vmax.f32 %v333_v34, %v334_v12  ;;  %v342_v42 = vmax.f32 %v340_v35, %v341_v37  ;;  %v2075_v9 = vadd.low.f32.bf16 %v1875_v23, %v1999_v38  ;;  %v2076_v14 = vadd.high.f32.bf16 %v1876_v24, %v1999_v38 }
  0xe3   :  { %v363_v48 = vmax.f32 %v361_v39, %v362_v43  ;;  %v370_v49 = vmax.f32 %v368_v40, %v369_v44  ;;  %v347_v50 = vsel %vm102_vm8, %v2073_v45, -inf  ;;  %v354_v51 = vsel %vm102_vm8, %v2074_v13, -inf }
  0xe4   :  { %v336_v46 = vrot.slane %v335_v41, 2  ;;  %v343_v47 = vrot.slane %v342_v42, 2  ;;  %v375_v52 = vsel %vm102_vm8, %v2075_v9, -inf  ;;  %v382_v15 = vsel %vm102_vm8, %v2076_v14, -inf  ;;  %v2435_v45 = vpop.permute.xlu0 %161 }
  0xe5   :  { %v364_v53 = vrot.slane %v363_v48, 2  ;;  %v371_v54 = vrot.slane %v370_v49, 2  ;;  %v348_v23 = vrot.slane %v347_v50, 4  ;;  %v355_v55 = vrot.slane %v354_v51, 4 }
  0xe6   :  { %v337_v10 = vmax.f32 %v335_v41, %v336_v46  ;;  %v344_v21 = vmax.f32 %v342_v42, %v343_v47  ;;  %v376_v16 = vrot.slane %v375_v52, 4  ;;  %v383_v24 = vrot.slane %v382_v15, 4 }
  0xe7   :  { %v365_v59 = vmax.f32 %v363_v48, %v364_v53  ;;  %v372_v63 = vmax.f32 %v370_v49, %v371_v54  ;;  %v349_v3 = vmax.f32 %v347_v50, %v348_v23  ;;  %v356_v5 = vmax.f32 %v354_v51, %v355_v55 }
  0xe8   :  { %v338_v56 = vrot.slane %v337_v10, 1  ;;  %v345_v57 = vrot.slane %v344_v21, 1  ;;  %v377_v6 = vmax.f32 %v375_v52, %v376_v16  ;;  %v384_v22 = vmax.f32 %v382_v15, %v383_v24 }
  0xe9   :  { %v366_v29 = vrot.slane %v365_v59, 1  ;;  %v373_v34 = vrot.slane %v372_v63, 1  ;;  %v350_v35 = vrot.slane %v349_v3, 2  ;;  %v357_v36 = vrot.slane %v356_v5, 2 }
  0xea   :  { %v339_v27 = vmax.f32 %v337_v10, %v338_v56  ;;  %v346_v28 = vmax.f32 %v344_v21, %v345_v57  ;;  %v378_v11 = vrot.slane %v377_v6, 2  ;;  %v385_v12 = vrot.slane %v384_v22, 2 }
  0xeb   :  { %v367_v39 = vmax.f32 %v365_v59, %v366_v29  ;;  %v130_v40 = vadd.f32 %v129_v31, %v2395_v7  ;;  %v351_v41 = vmax.f32 %v349_v3, %v350_v35  ;;  %v358_v42 = vmax.f32 %v356_v5, %v357_v36 }
  0xec   :  { %v413_v37 = vpack.c.bf16 %v339_v27, %v339_v27  ;;  %v414_v38 = vpack.c.bf16 %v346_v28, %v346_v28  ;;  %v379_v43 = vmax.f32 %v377_v6, %v378_v11  ;;  %v386_v44 = vmax.f32 %v384_v22, %v385_v12 }
  0xed   :  { %v374_v13 = vmax.f32 %v372_v63, %v373_v34  ;;  %v151_v9 = vadd.f32 %v150_v32, %v2397_v17  ;;  %v2443_v14 = vadd.f32 %v157_v33, %v2399_v18  ;;  %v352_v46 = vrot.slane %v351_v41, 1 }
  0xee   :  { %v359_v7 = vrot.slane %v358_v42, 1  ;;  %v380_v31 = vrot.slane %v379_v43, 1  ;;  %v387_v47 = vrot.slane %v386_v44, 1  ;;  %v445_v48 = vunpack.c.l.b16 %v413_v37 }
  0xef   :  { %v446_v49 = vunpack.c.l.b16 %v414_v38  ;;  %v417_v50 = vpack.c.bf16 %v367_v39, %v367_v39  ;;  %v163_v51 = vrot.slane %v2435_v45, 1  ;;  %v353_v52 = vmax.f32 %v351_v41, %v352_v46 }
  0xf0   :  { %v360_v15 = vmax.f32 %v358_v42, %v359_v7  ;;  %v381_v10 = vmax.f32 %v379_v43, %v380_v31  ;;  %v418_v17 = vpack.c.bf16 %v374_v13, %v374_v13  ;;  %v164_v32 = vrot.slane %v2435_v45, 2  ;;  %v435_v43 = vld [vmem:[#allocation7 + $0x70] sm:$0xff] }
  0xf1   :  { %v165_v18 = vrot.slane %v2435_v45, 3  ;;  %v166_v33 = vrot.slane %v2435_v45, 4  ;;  %v415_v21 = vpack.c.bf16 %v353_v52, %v353_v52  ;;  %v388_v54 = vmax.f32 %v386_v44, %v387_v47  ;;  %v432_v44 = vld [vmem:[#allocation7 + $0x58] sm:$0xff] }
  0xf2   :  { %v416_v53 = vpack.c.bf16 %v360_v15, %v360_v15  ;;  %v167_v23 = vrot.slane %v2435_v45, 5  ;;  %v454_v55 = vsel %vm453_vm9, %v446_v49, %v445_v48  ;;  %v449_v16 = vunpack.c.l.b16 %v417_v50 }
  0xf3   :  { %v178_v24 = vmul.f32 %v2435_v45, %v2401_v19  ;;  %v179_v56 = vmul.f32 %v163_v51, %v2403_v20  ;;  %v447_v57 = vunpack.c.l.b16 %v415_v21  ;;  %v419_v63 = vpack.c.bf16 %v381_v10, %v381_v10 }
  0xf4   :  { %v448_v59 = vunpack.c.l.b16 %v416_v53  ;;  %v168_v3 = vrot.slane %v2435_v45, 6  ;;  %v450_v5 = vunpack.c.l.b16 %v418_v17  ;;  %v180_v6 = vmul.f32 %v164_v32, %v2409_v30  ;;  %v431_v30 = vld [vmem:[#allocation7 + $0x50] sm:$0xff]  ;;  %v401_v53 = vld [vmem:[#allocation5 + $0x20] sm:$0xff] }
  0xf5   :  { %v181_v22 = vmul.f32 %v165_v18, %v130_v40  ;;  %v182_v27 = vmul.f32 %v166_v33, %v2405_v25  ;;  %v456_v28 = vsel %vm455_vm10, %v447_v57, %v454_v55  ;;  %v420_v29 = vpack.c.bf16 %v388_v54, %v388_v54  ;;  %v397_v18 = vld [vmem:[#allocation5] sm:$0xff]  ;;  %v398_v54 = vld [vmem:[#allocation5 + $0x8] sm:$0xff] }
  0xf6   :  { %v183_v34 = vmul.f32 %v167_v23, %v2407_v26  ;;  %v389_v19 = vpack.c.bf16 %v178_v24, %v178_v24  ;;  %v458_v20 = vsel %vm457_vm11, %v448_v59, %v456_v28  ;;  %v390_v35 = vpack.c.bf16 %v179_v56, %v179_v56  ;;  %v436_v26 = vld [vmem:[#allocation7 + $0x78] sm:$0xff]  ;;  %v402_v23 = vld [vmem:[#allocation5 + $0x28] sm:$0xff] }
  0xf7   :  { %v391_v36 = vpack.c.bf16 %v180_v6, %v180_v6  ;;  %v392_v11 = vpack.c.bf16 %v181_v22, %v181_v22  ;;  %v451_v12 = vunpack.c.l.b16 %v419_v63  ;;  %v169_v37 = vrot.slane %v2435_v45, 7 }
  0xf8   :  { %v184_v38 = vmul.f32 %v168_v3, %v151_v9  ;;  %v393_v39 = vpack.c.bf16 %v182_v27, %v182_v27  ;;  %v724_v40 = vunpack.c.l.b16 %v390_v35  ;;  %v460_v42 = vsel %vm459_vm12, %v449_v16, %v458_v20  ;;  %v405_v3 = vld [vmem:[#allocation5 + $0x40] sm:$0xff]  ;;  %v400_v20 = vld [vmem:[#allocation5 + $0x18] sm:$0xff] }
  0xf9   :  { %v725_v41 = vunpack.c.l.b16 %v391_v36  ;;  %v726_v25 = vunpack.c.l.b16 %v392_v11  ;;  %v452_v13 = vunpack.c.l.b16 %v420_v29  ;;  %v394_v46 = vpack.c.bf16 %v183_v34, %v183_v34  ;;  %v399_v34 = vld [vmem:[#allocation5 + $0x10] sm:$0xff]  ;;  %v404_v35 = vld [vmem:[#allocation5 + $0x38] sm:$0xff] }
  0xfa   :  { %v723_v7 = vunpack.c.l.b16 %v389_v19  ;;  %v462_v31 = vsel %vm461_vm13, %v450_v5, %v460_v42  ;;  %v727_v47 = vunpack.c.l.b16 %v393_v39  ;;  %v731_v48 = vrot.slane %v724_v40, 7  ;;  %v403_v19 = vld [vmem:[#allocation5 + $0x30] sm:$0xff]  ;;  %v412_v42 = vld [vmem:[#allocation5 + $0x78] sm:$0xff] }
  0xfb   :  { %v733_v49 = vrot.slane %v725_v41, 6  ;;  %v464_v45 = vsel %vm463_vm14, %v451_v12, %v462_v31  ;;  %v185_v9 = vmul.f32 %v169_v37, %v2443_v14  ;;  %v1769_v51 = vcombine.high %v431_v30, %v435_v43  ;;  %v411_v41 = vld [vmem:[#allocation5 + $0x70] sm:$0xff] }
  0xfc   :  { %v466_v50 = vsel %vm465_vm15, %v452_v13, %v464_v45  ;;  %v1771_v52 = vcombine.high %v432_v44, %v436_v26  ;;  %v395_v15 = vpack.c.bf16 %v184_v38, %v184_v38  ;;  %v732_v10 = vsel %vm453_vm9, %v731_v48, %v723_v7  ;;  %v2004_v48 = vld [vmem:[#allocation8 + $0xc0] sm:$0xff]  }
  0xfd   :  { %v735_v17 = vrot.slane %v726_v25, 5  ;;  %v467_v32 = vpack.c.b16 %v466_v50, %v466_v50  ;;  %v728_v33 = vunpack.c.l.b16 %v394_v46  ;;  %v734_v21 = vsel %vm455_vm10, %v733_v49, %v732_v10  ;;  %v408_v25 = vld [vmem:[#allocation5 + $0x58] sm:$0xff]  ;;  %v2005_v49 = vld [vmem:[#allocation8] sm:$0xff]   ;;  %v2008_v50 = vld [vmem:[#allocation8 + $0xc8] sm:$0xff]  }
  0xfe   :  { %v737_v55 = vrot.slane %v727_v47, 4  ;;  %v1768_v16 = vcombine.low %v431_v30, %v435_v43  ;;  %v1770_v24 = vcombine.low %v432_v44, %v436_v26  ;;  %v396_v56 = vpack.c.bf16 %v185_v9, %v185_v9  ;;  %v407_v30 = vld [vmem:[#allocation5 + $0x50] sm:$0xff]  ;;  %v2003_v47 = vld [vmem:[#allocation8 + $0x40] sm:$0xff]   ;;  %v2007_v9 = vld [vmem:[#allocation8 + $0x48] sm:$0xff]  }
  0xff   :  { %1772 = vmatmul.mubr.msk.bf16.vlgmr.msra.gmra.mrb[0].mxu0 %vm102_vm8, %v467_v32  ;;  %1773 = vmatmul.mubr.msk.bf16.vlgmr.msra.gmra.mrb[0].mxu1 %vm102_vm8, %v467_v32  ;;  %v736_v14 = vsel %vm457_vm11, %v735_v17, %v734_v21  ;;  %v729_v57 = vunpack.c.l.b16 %v395_v15  ;;  %v1777_v59 = vcombine.high %v397_v18, %v401_v53  ;;  %v1779_v63 = vcombine.high %v398_v54, %v402_v23  ;;  %v2006_v45 = vld [vmem:[#allocation8 + $0x80] sm:$0xff]   ;;  %v2012_v15 = vld [vmem:[#allocation8 + $0xd0] sm:$0xff]   ;;  %v2018_v21 = vld [vmem:[#allocation8 + $0x98] sm:$0xff]  }
 0x100   :  { %634 = vmatpush1.bf16.msra.mxu0 %v1760_v0  ;;  %675 = vmatpush1.bf16.msra.mxu1 %v1762_v2  ;;  %v738_v5 = vsel %vm459_vm12, %v737_v55, %v736_v14  ;;  %v739_v6 = vrot.slane %v728_v33, 3  ;;  %v1776_v62 = vcombine.low %v397_v18, %v401_v53  ;;  %v1778_v0 = vcombine.low %v398_v54, %v402_v23  ;;  %v2013_v10 = vld [vmem:[#allocation8 + $0x10] sm:$0xff]   ;;  %v2016_v18 = vld [vmem:[#allocation8 + $0xd8] sm:$0xff]   ;;  %v2019_v53 = vld [vmem:[#allocation8 + $0x60] sm:$0xff]  }
 0x101   :  { %635 = vmatprep.subr.bf16.mxu0 %v1769_v51  ;;  %676 = vmatprep.subr.bf16.mxu1 %v1771_v52  ;;  %v730_v2 = vunpack.c.l.b16 %v396_v56  ;;  %v1785_v27 = vcombine.high %v405_v3, %v409_v58  ;;  %v1787_v28 = vcombine.high %v406_v60, %v410_v61  ;;  %v741_v29 = vrot.slane %v729_v57, 2  ;;  %v2009_v51 = vld [vmem:[#allocation8 + $0x8] sm:$0xff]   ;;  %v2014_v17 = vld [vmem:[#allocation8 + $0x90] sm:$0xff]   ;;  %v2017_v33 = vld [vmem:[#allocation8 + $0x18] sm:$0xff]  }
 0x102   :  { %665 = vmatprep.mubr.bf16.mxu0 %v2203_v1  ;;  %706 = vmatprep.mubr.bf16.mxu1 %v2203_v1  ;;  %v740_v22 = vsel %vm461_vm13, %v739_v6, %v738_v5  ;;  %v1784_v11 = vcombine.low %v405_v3, %v409_v58  ;;  %v1786_v12 = vcombine.low %v406_v60, %v410_v61  ;;  %v2010_v52 = vld [vmem:[#allocation8 + $0x88] sm:$0xff]   ;;  %v2020_v54 = vld [vmem:[#allocation8 + $0xe0] sm:$0xff]   ;;  %v2027_v57 = vld [vmem:[#allocation8 + $0x70] sm:$0xff]  }
 0x103   :  { %v742_v36 = vsel %vm463_vm14, %v741_v29, %v740_v22  ;;  %v743_v37 = vrot.slane %v730_v2, 1  ;;  %v1781_v38 = vcombine.high %v399_v34, %v403_v19  ;;  %v1783_v39 = vcombine.high %v400_v20, %v404_v35  ;;  %v2021_v23 = vld [vmem:[#allocation8 + $0x20] sm:$0xff]   ;;  %v2023_v14 = vld [vmem:[#allocation8 + $0x68] sm:$0xff]   ;;  %v2030_v3 = vld [vmem:[#allocation8 + $0xb0] sm:$0xff]  }
 0x104   :  { %636 = vmatpush1.bf16.msra.mxu0 %v1768_v16  ;;  %677 = vmatpush1.bf16.msra.mxu1 %v1770_v24  ;;  %v1780_v43 = vcombine.low %v399_v34, %v403_v19  ;;  %v1782_v44 = vcombine.low %v400_v20, %v404_v35  ;;  %v1789_v13 = vcombine.high %v407_v30, %v411_v41  ;;  %v2022_v55 = vld [vmem:[#allocation8 + $0xa0] sm:$0xff]   ;;  %v2024_v16 = vld [vmem:[#allocation8 + $0xe8] sm:$0xff]   ;;  %v2031_v5 = vld [vmem:[#allocation8 + $0x78] sm:$0xff]  }
 0x105   :  { %829 = vmatprep.subr.bf16.mxu0 %v1777_v59  ;;  %870 = vmatprep.subr.bf16.mxu1 %v1779_v63  ;;  %v744_v40 = vsel %vm465_vm15, %v743_v37, %v742_v36  ;;  %v1791_v46 = vcombine.high %v408_v25, %v412_v42  ;;  %v1788_v7 = vcombine.low %v407_v30, %v411_v41  ;;  %v2025_v24 = vld [vmem:[#allocation8 + $0x28] sm:$0xff]   ;;  %v2028_v59 = vld [vmem:[#allocation8 + $0xf0] sm:$0xff]   ;;  %v2032_v6 = vld [vmem:[#allocation8 + $0xf8] sm:$0xff]   ;;  %v1005_v30 = vsub.s32 2, %v2316_v4 }
 0x106   :  { %v745_v26 = vpack.c.b16 %v744_v40, %v744_v40  ;;  %v1790_v31 = vcombine.low %v408_v25, %v412_v42  ;;  %v2026_v56 = vld [vmem:[#allocation8 + $0xa8] sm:$0xff]   ;;  %v2029_v63 = vld [vmem:[#allocation8 + $0x30] sm:$0xff]   ;;  %v2033_v58 = vld [vmem:[#allocation8 + $0x38] sm:$0xff]   ;;  %v1001_v41 = vsub.s32 1, %v2316_v4  ;;  %v1009_v25 = vsub.s32 3, %v2316_v4 }
 0x107   :  { %1774 = vmatmul.mubr.msk.bf16.vlgmr.msra.gmra.mrb[4].mxu0 %vm102_vm8, %v467_v32  ;;  %1775 = vmatmul.mubr.msk.bf16.vlgmr.msra.gmra.mrb[4].mxu1 %vm102_vm8, %v467_v32  ;;  %v2015_v32 = vld [vmem:[#allocation8 + $0x58] sm:$0xff]   ;;  %v2035_v61 = vld [vmem:[#allocation8 + $0x140] sm:$0xff]  }
 0x108   :  { %830 = vmatpush1.bf16.msra.mxu0 %v1776_v62  ;;  %871 = vmatpush1.bf16.msra.mxu1 %v1778_v0  ;;  %v2034_v60 = vld [vmem:[#allocation8 + $0xb8] sm:$0xff]   ;;  %v2036_v62 = vld [vmem:[#allocation8 + $0x1c0] sm:$0xff]  }
 0x109   :  { %831 = vmatprep.subr.bf16.mxu0 %v1785_v27  ;;  %872 = vmatprep.subr.bf16.mxu1 %v1787_v28  ;;  %v2497_v40 = vld [vmem:[%s2539_s4] sm:$0xff] }
 0x10a   :  { %861 = vmatprep.mubr.bf16.mxu0 %v2203_v1  ;;  %902 = vmatprep.mubr.bf16.mxu1 %v2203_v1  ;;  %v998_v42 = vrot.slane %v2497_v40, %v2325_v8 }
 0x10c   :  { %832 = vmatpush1.bf16.msra.mxu0 %v1784_v11  ;;  %873 = vmatpush1.bf16.msra.mxu1 %v1786_v12 }
 0x10d   :  { %911 = vmatprep.subr.bf16.mxu0 %v1781_v38  ;;  %952 = vmatprep.subr.bf16.mxu1 %v1783_v39 }
 0x10f   :  { %1792 = vmatmul.mubr.msk.bf16.vlgmr.msra.gmra.mrb[8].mxu0 %vm102_vm8, %v745_v26  ;;  %1793 = vmatmul.mubr.msk.bf16.vlgmr.msra.gmra.mrb[8].mxu1 %vm102_vm8, %v745_v26 }
 0x110   :  { %912 = vmatpush1.bf16.msra.mxu0 %v1780_v43  ;;  %953 = vmatpush1.bf16.msra.mxu1 %v1782_v44  ;;  %v1006_v43 = vrot.slane %v2497_v40, %v1005_v30  ;;  %v2046_v30 = vld [vmem:[#allocation8 + $0x190] sm:$0xff]  }
 0x111   :  { %913 = vmatprep.subr.bf16.mxu0 %v1789_v13  ;;  %954 = vmatprep.subr.bf16.mxu1 %v1791_v46  ;;  %v1002_v13 = vrot.slane %v2497_v40, %v1001_v41  ;;  %v1010_v46 = vrot.slane %v2497_v40, %v1009_v25  ;;  %v2047_v41 = vld [vmem:[#allocation8 + $0x158] sm:$0xff]  }
 0x112   :  { %943 = vmatprep.mubr.bf16.mxu0 %v2203_v1  ;;  %984 = vmatprep.mubr.bf16.mxu1 %v2203_v1  ;;  %v2011_v1 = vld [vmem:[#allocation8 + $0x50] sm:$0xff]   ;;  %v2048_v25 = vld [vmem:[#allocation8 + $0x1d8] sm:$0xff]  }
 0x114   :  { %914 = vmatpush1.bf16.msra.mxu0 %v1788_v7  ;;  %955 = vmatpush1.bf16.msra.mxu1 %v1790_v31 }
 0x115   :  { %1880 = vmatprep.subr.bf16.mxu0 %v2003_v47  ;;  %1902 = vmatprep.subr.bf16.mxu1 %v2004_v48 }
 0x117   :  { %1794 = vmatmul.mubr.msk.bf16.vlgmr.msra.gmra.mrb[12].mxu0 %vm102_vm8, %v745_v26  ;;  %1795 = vmatmul.mubr.msk.bf16.vlgmr.msra.gmra.mrb[12].mxu1 %vm102_vm8, %v745_v26 }
 0x118   :  { %1881 = vmatpush3.bf16.msra.mxu0 %v2005_v49  ;;  %1903 = vmatpush3.bf16.msra.mxu1 %v2006_v45 }
 0x119   :  { %1882 = vmatprep.subr.bf16.mxu0 %v2007_v9  ;;  %1904 = vmatprep.subr.bf16.mxu1 %v2008_v50 }
 0x11c   :  { %1883 = vmatpush3.bf16.msra.mxu0 %v2009_v51  ;;  %1905 = vmatpush3.bf16.msra.mxu1 %v2010_v52 }
 0x11d   :  { %1884 = vmatprep.subr.bf16.mxu0 %v2011_v1  ;;  %1906 = vmatprep.subr.bf16.mxu1 %v2012_v15 }
 0x120   :  { %1885 = vmatpush3.bf16.msra.mxu0 %v2013_v10  ;;  %1907 = vmatpush3.bf16.msra.mxu1 %v2014_v17  ;;  %v1017_v17 = vsub.s32 5, %v2316_v4 }
 0x121   :  { %1886 = vmatprep.subr.bf16.mxu0 %v2015_v32  ;;  %1908 = vmatprep.subr.bf16.mxu1 %v2016_v18  ;;  %v1025_v32 = vsub.s32 7, %v2316_v4 }
 0x124   :  { %1887 = vmatpush3.bf16.msra.mxu0 %v2017_v33  ;;  %1909 = vmatpush3.bf16.msra.mxu1 %v2018_v21 }
 0x125   :  { %1888 = vmatprep.subr.bf16.mxu0 %v2019_v53  ;;  %1910 = vmatprep.subr.bf16.mxu1 %v2020_v54 }
 0x128   :  { %1889 = vmatpush3.bf16.msra.mxu0 %v2021_v23  ;;  %1911 = vmatpush3.bf16.msra.mxu1 %v2022_v55 }
 0x129   :  { %1890 = vmatprep.subr.bf16.mxu0 %v2023_v14  ;;  %1912 = vmatprep.subr.bf16.mxu1 %v2024_v16  ;;  %v1018_v16 = vrot.slane %v2497_v40, %v1017_v17  ;;  %v2064_v17 = vld [vmem:[#allocation8 + $0x1f8] sm:$0xff]  }
 0x12c   :  { %1891 = vmatpush3.bf16.msra.mxu0 %v2025_v24  ;;  %1913 = vmatpush3.bf16.msra.mxu1 %v2026_v56  ;;  %v1026_v24 = vrot.slane %v2497_v40, %v1025_v32  ;;  %v2037_v56 = vld [vmem:[#allocation8 + $0x100] sm:$0xff]   ;;  %v2065_v32 = vld [vmem:[#allocation8 + $0x138] sm:$0xff]  }
 0x12d   :  { %1892 = vmatprep.subr.bf16.mxu0 %v2027_v57  ;;  %1914 = vmatprep.subr.bf16.mxu1 %v2028_v59  ;;  %v2038_v57 = vld [vmem:[#allocation8 + $0x180] sm:$0xff]  }
 0x130   :  { %1893 = vmatpush3.bf16.msra.mxu0 %v2029_v63  ;;  %1915 = vmatpush3.bf16.msra.mxu1 %v2030_v3 }
 0x131   :  { %1894 = vmatprep.subr.bf16.mxu0 %v2031_v5  ;;  %1916 = vmatprep.subr.bf16.mxu1 %v2032_v6 }
 0x134   :  { %1895 = vmatpush3.bf16.msra.mxu0 %v2033_v58  ;;  %1917 = vmatpush3.bf16.msra.mxu1 %v2034_v60  ;;  %v2039_v60 = vld [vmem:[#allocation8 + $0x148] sm:$0xff]  }
 0x135   :  { %1924 = vmatprep.subr.bf16.mxu0 %v2035_v61  ;;  %1946 = vmatprep.subr.bf16.mxu1 %v2036_v62  ;;  %v2040_v61 = vld [vmem:[#allocation8 + $0x1c8] sm:$0xff]  }
 0x1d2   :  { %v585_v0 = vpop.f32.mrb[0].mxu0  ;;  %v626_v2 = vpop.f32.mrb[0].mxu1 }
 0x1d3   :  { %v587_v22 = vpop.f32.mrb[1].mxu0  ;;  %v628_v27 = vpop.f32.mrb[1].mxu1 }
 0x1d4   :  { %v589_v28 = vpop.f32.mrb[2].mxu0  ;;  %v630_v29 = vpop.f32.mrb[2].mxu1 }
 0x1d5   :  { %v590_v34 = vpop.f32.mrb[3].mxu0  ;;  %v631_v19 = vpop.f32.mrb[3].mxu1 }
 0x1d6   :  { %v2041_v19 = vld [vmem:[#allocation8 + $0x108] sm:$0xff]  }
 0x1da   :  { %v667_v20 = vpop.f32.mrb[4].mxu0  ;;  %v708_v35 = vpop.f32.mrb[4].mxu1 }
 0x1db   :  { %v669_v36 = vpop.f32.mrb[5].mxu0  ;;  %v710_v11 = vpop.f32.mrb[5].mxu1 }
 0x1dc   :  { %v671_v12 = vpop.f32.mrb[6].mxu0  ;;  %v712_v37 = vpop.f32.mrb[6].mxu1 }
 0x1dd   :  { %v672_v38 = vpop.f32.mrb[7].mxu0  ;;  %v713_v39 = vpop.f32.mrb[7].mxu1  ;;  %v2044_v12 = vld [vmem:[#allocation8 + $0x1d0] sm:$0xff]  }
 0x1de   :  { %v2045_v39 = vld [vmem:[#allocation8 + $0x110] sm:$0xff]  }
 0x1e2   :  { %v863_v44 = vpop.f32.mrb[8].mxu0  ;;  %v904_v26 = vpop.f32.mrb[8].mxu1 }
 0x1e3   :  { %v864_v7 = vadd.f32 %v863_v44, %v585_v0  ;;  %v905_v31 = vadd.f32 %v904_v26, %v626_v2  ;;  %v865_v47 = vpop.f32.mrb[9].mxu0  ;;  %v906_v48 = vpop.f32.mrb[9].mxu1  ;;  %v2051_v44 = vld [vmem:[#allocation8 + $0x160] sm:$0xff]  }
 0x1e4   :  { %v866_v49 = vadd.f32 %v865_v47, %v587_v22  ;;  %v907_v45 = vadd.f32 %v906_v48, %v628_v27  ;;  %v867_v9 = vpop.f32.mrb[10].mxu0  ;;  %v908_v50 = vpop.f32.mrb[10].mxu1  ;;  %v2052_v26 = vld [vmem:[#allocation8 + $0x1e0] sm:$0xff]   ;;  %v2055_v47 = vld [vmem:[#allocation8 + $0x168] sm:$0xff]  }
 0x1e5   :  { %v1035_v51 = vadd.f32 %v998_v42, %v864_v7  ;;  %v1037_v52 = vadd.f32 %v1006_v43, %v905_v31  ;;  %v868_v1 = vpop.f32.mrb[11].mxu0  ;;  %v909_v8 = vpop.f32.mrb[11].mxu1  ;;  %v2049_v42 = vld [vmem:[#allocation8 + $0x118] sm:$0xff]   ;;  %v1013_v7 = vsub.s32 4, %v2316_v4  ;;  %v1021_v31 = vsub.s32 6, %v2316_v4  ;;  %v2056_v48 = vld [vmem:[#allocation8 + $0x1e8] sm:$0xff]  }
 0x1e6   :  { %v1036_v15 = vadd.f32 %v1002_v13, %v866_v49  ;;  %v1038_v10 = vadd.f32 %v1010_v46, %v907_v45  ;;  %v2050_v43 = vld [vmem:[#allocation8 + $0x198] sm:$0xff]   ;;  %v2053_v13 = vld [vmem:[#allocation8 + $0x120] sm:$0xff]   ;;  %v2057_v49 = vld [vmem:[#allocation8 + $0x128] sm:$0xff]  }
 0x1e7   :  { %v1043_v18 = vmax.f32 %v1035_v51, 0.0  ;;  %v1045_v33 = vmax.f32 %v1037_v52, 0.0  ;;  %v2054_v46 = vld [vmem:[#allocation8 + $0x1a0] sm:$0xff]   ;;  %v2058_v45 = vld [vmem:[#allocation8 + $0x1a8] sm:$0xff]   ;;  %v1014_v9 = vrot.slane %v2497_v40, %v1013_v7  ;;  %v1022_v50 = vrot.slane %v2497_v40, %v1021_v31  ;;  %v2059_v51 = vld [vmem:[#allocation8 + $0x170] sm:$0xff]  }
 0x1e8   :  { %v1044_v21 = vmax.f32 %v1036_v15, 0.0  ;;  %v1046_v53 = vmax.f32 %v1038_v10, 0.0  ;;  %v2060_v52 = vld [vmem:[#allocation8 + $0x1f0] sm:$0xff]   ;;  %v2063_v10 = vld [vmem:[#allocation8 + $0x178] sm:$0xff]  }
 0x1e9   :  { %v1051_v59 = vpack.c.bf16 %v1043_v18, %v1043_v18  ;;  %v1053_v63 = vpack.c.bf16 %v1045_v33, %v1045_v33  ;;  %v2061_v1 = vld [vmem:[#allocation8 + $0x130] sm:$0xff]   ;;  %v2066_v40 = vld [vmem:[#allocation8 + $0x1b8] sm:$0xff]  }
 0x1ea   :  { %v1052_v54 = vpack.c.bf16 %v1044_v21, %v1044_v21  ;;  %v1054_v23 = vpack.c.bf16 %v1046_v53, %v1046_v53  ;;  %v945_v55 = vpop.f32.mrb[12].mxu0  ;;  %v986_v14 = vpop.f32.mrb[12].mxu1  ;;  %v2062_v4 = vld [vmem:[#allocation8 + $0x1b0] sm:$0xff]  }
 0x1eb   :  { %v2510_v3 = vadd.f32 %v945_v55, %v667_v20  ;;  %v2512_v5 = vadd.f32 %v986_v14, %v708_v35  ;;  %v947_v6 = vpop.f32.mrb[13].mxu0  ;;  %v988_v58 = vpop.f32.mrb[13].mxu1  ;;  %v2042_v20 = vld [vmem:[#allocation8 + $0x188] sm:$0xff]   ;;  %v2043_v35 = vld [vmem:[#allocation8 + $0x150] sm:$0xff]   ;;  %v1796_v55 = vld [vmem:[%s2541_s6] ss:$0 sm:$0xff] }
 0x1ec   :  { %v948_v62 = vadd.f32 %v947_v6, %v669_v36  ;;  %v989_v0 = vadd.f32 %v988_v58, %v710_v11  ;;  %v949_v2 = vpop.f32.mrb[14].mxu0  ;;  %v990_v22 = vpop.f32.mrb[14].mxu1  ;;  %1610 = vmatprep.mubr.bf16.mxu0 %v1052_v54  ;;  %1650 = vmatprep.mubr.bf16.mxu1 %v1054_v23  ;;  %s2206_s6 = smov [#allocation10]  }
 0x1ed   :  { %v950_v27 = vpop.f32.mrb[15].mxu0  ;;  %v991_v28 = vpop.f32.mrb[15].mxu1  ;;  %1611 = vmatmul.mubr.bf16.vlgmr.msra.gmra.mrb[16].mxu0 %v1051_v59  ;;  %1651 = vmatmul.mubr.bf16.vlgmr.msra.gmra.mrb[16].mxu1 %v1053_v63  ;;  %v1039_v8 = vadd.f32 %v1014_v9, %v2510_v3  ;;  %v1041_v15 = vadd.f32 %v1022_v50, %v2512_v5  ;;  %s1745_s29 = sshll.u32 %s2206_s6, 4  ;;  %s1746_s29 = int_to_ptr.vmem [resolvable:$true] %s1745_s29 }
 0x1ee   :  { %v1040_v29 = vadd.f32 %v1018_v16, %v948_v62  ;;  %v1042_v34 = vadd.f32 %v1026_v24, %v989_v0  ;;  %1925 = vmatpush3.bf16.msra.mxu0 %v2037_v56  ;;  %1947 = vmatpush3.bf16.msra.mxu1 %v2038_v57  ;;  %s2165_s30 = scalar_lea.vmem %s1746_s29, 128  ;;  %p2170_p5 = scmp.lt.s32.totalorder %s1746_s29, %s1746_s29 }
 0x1ef   :  { %1926 = vmatprep.subr.bf16.mxu0 %v2039_v60  ;;  %1948 = vmatprep.subr.bf16.mxu1 %v2040_v61  ;;  %v1047_v18 = vmax.f32 %v1039_v8, 0.0  ;;  %v1049_v33 = vmax.f32 %v1041_v15, 0.0  ;;  %p2166_p4 = scmp.ne.s32.totalorder %s1746_s29, %s2165_s30  ;;  %p2171_p6 = scmp.lt.s32.totalorder %s2165_s30, %s2165_s30 }
 0x1f0   :  { %v1048_v36 = vmax.f32 %v1040_v29, 0.0  ;;  %v1050_v11 = vmax.f32 %v1042_v34, 0.0 }
 0x1f1   :  { %v1055_v21 = vpack.c.bf16 %v1047_v18, %v1047_v18  ;;  %v1057_v53 = vpack.c.bf16 %v1049_v33, %v1049_v33  ;;  %p2172_p7 = por %p2171_p6, %p2170_p5 }
 0x1f2   :  { %v1056_v37 = vpack.c.bf16 %v1048_v36, %v1048_v36  ;;  %v1058_v38 = vpack.c.bf16 %v1050_v11, %v1050_v11  ;;  %1927 = vmatpush3.bf16.msra.mxu0 %v2041_v19  ;;  %1949 = vmatpush3.bf16.msra.mxu1 %v2042_v20 }
 0x1f3   :  { %1928 = vmatprep.subr.bf16.mxu0 %v2043_v35  ;;  %1950 = vmatprep.subr.bf16.mxu1 %v2044_v12  ;;  %p2173_p8 = pnand %p2172_p7, %p2166_p4 }
 0x1f4   :  { %1690 = vmatprep.mubr.bf16.mxu0 %v1056_v37  ;;  %1730 = vmatprep.mubr.bf16.mxu1 %v1058_v38 }
 0x1f6   :  { %1929 = vmatpush3.bf16.msra.mxu0 %v2045_v39  ;;  %1951 = vmatpush3.bf16.msra.mxu1 %v2046_v30 }
 0x1f7   :  { %1930 = vmatprep.subr.bf16.mxu0 %v2047_v41  ;;  %1952 = vmatprep.subr.bf16.mxu1 %v2048_v25 }
 0x1fa   :  { %1931 = vmatpush3.bf16.msra.mxu0 %v2049_v42  ;;  %1953 = vmatpush3.bf16.msra.mxu1 %v2050_v43 }
 0x1fb   :  { %1932 = vmatprep.subr.bf16.mxu0 %v2051_v44  ;;  %1954 = vmatprep.subr.bf16.mxu1 %v2052_v26 }
 0x1fe   :  { %1933 = vmatpush3.bf16.msra.mxu0 %v2053_v13  ;;  %1955 = vmatpush3.bf16.msra.mxu1 %v2054_v46 }
 0x1ff   :  { %1934 = vmatprep.subr.bf16.mxu0 %v2055_v47  ;;  %1956 = vmatprep.subr.bf16.mxu1 %v2056_v48 }
 0x202   :  { %1935 = vmatpush3.bf16.msra.mxu0 %v2057_v49  ;;  %1957 = vmatpush3.bf16.msra.mxu1 %v2058_v45 }
 0x203   :  { %1936 = vmatprep.subr.bf16.mxu0 %v2059_v51  ;;  %1958 = vmatprep.subr.bf16.mxu1 %v2060_v52 }
 0x206   :  { %1937 = vmatpush3.bf16.msra.mxu0 %v2061_v1  ;;  %1959 = vmatpush3.bf16.msra.mxu1 %v2062_v4 }
 0x207   :  { %1938 = vmatprep.subr.bf16.mxu0 %v2063_v10  ;;  %1960 = vmatprep.subr.bf16.mxu1 %v2064_v17 }
 0x20a   :  { %1939 = vmatpush3.bf16.msra.mxu0 %v2065_v32  ;;  %1961 = vmatpush3.bf16.msra.mxu1 %v2066_v40 }
 0x20d   :  { %1691 = vmatmul.mubr.bf16.vlgmr.msra.gmra.mrb[20].mxu0 %v1055_v21  ;;  %1731 = vmatmul.mubr.bf16.vlgmr.msra.gmra.mrb[20].mxu1 %v1057_v53 }
 0x2c0   :  { %v1896_v54 = vpop.f32.mrb[16].mxu0  ;;  %v1918_v23 = vpop.f32.mrb[16].mxu1 }
 0x2c1   :  { %v1897_v14 = vpop.f32.mrb[17].mxu0  ;;  %v1919_v16 = vpop.f32.mrb[17].mxu1 }
 0x2c2   :  { %v1898_v24 = vadd.f32 %v1897_v14, %v1896_v54  ;;  %v1920_v56 = vadd.f32 %v1919_v16, %v1918_v23  ;;  %v1899_v57 = vpop.f32.mrb[18].mxu0  ;;  %v1921_v59 = vpop.f32.mrb[18].mxu1 }
 0x2c3   :  { %v1900_v63 = vpop.f32.mrb[19].mxu0  ;;  %v1922_v3 = vpop.f32.mrb[19].mxu1 }
 0x2c4   :  { %v1613_v5 = vadd.f32 %v1898_v24, %v1796_v55 }
 0x2c6   :  { %v1653_v6 = vadd.f32 %v1920_v56, %v1613_v5 }
 0x2e0   :  { %v1940_v58 = vpop.f32.mrb[20].mxu0  ;;  %v1962_v60 = vpop.f32.mrb[20].mxu1 }
 0x2e1   :  { %v1941_v61 = vpop.f32.mrb[21].mxu0  ;;  %v1963_v62 = vpop.f32.mrb[21].mxu1 }
 0x2e2   :  { %v1942_v0 = vadd.f32 %v1941_v61, %v1940_v58  ;;  %v1964_v2 = vadd.f32 %v1963_v62, %v1962_v60  ;;  %v1943_v22 = vpop.f32.mrb[22].mxu0  ;;  %v1965_v27 = vpop.f32.mrb[22].mxu1 }
 0x2e3   :  { %v1944_v28 = vpop.f32.mrb[23].mxu0  ;;  %v1966_v29 = vpop.f32.mrb[23].mxu1 }
 0x2e4   :  { %v1693_v34 = vadd.f32 %v1942_v0, %v1653_v6 }
 0x2e6   :  { %v1733_v19 = vadd.f32 %v1964_v2, %v1693_v34 }
 0x2e8   :  { %1738 = vst [vmem:[#allocation10] sm:$0xff] %v1733_v19 }
 0x2e9   :  { %2176 = shalt.err (!%p2173_p8)
}
 0x2ea   :  { %s2177_s10 = scalar_lea.hbm %s2542_s7, 128 }
 0x2eb   :  { %p2178_p9 = scmp.ne.s32.totalorder %s2542_s7, %s2177_s10  ;;  %p2181_p10 = scmp.lt.u32.totalorder %s2177_s10, %s2542_s7 }
 0x2ed   :  { %p2183_p11 = pnand %p2181_p10, %p2178_p9 }
 0x2ef   :  { %2186 = shalt.err (!%p2183_p11)
}
 0x2f0   :  { %1748 = dma.vmem_to_hbm [thread:$0]  %s1746_s29, 128, %s2542_s7, [#allocation4]  }
 0x2f1   :  { %2193 = dma.done.wait [#allocation4], 128  }
 0x2f2   :  { %2194 = vsyncadd [#allocation4], 4294967168 }
 0x2f3   :  { %1752 = vsyncpa [#allocation3], 1 }
 0x2f4   :  { %1753 = vsyncpa [#allocation6], 1 }
 0x2f5   :  { %1754 = vsyncpa [#allocation9], 1 }
 0x2f6   :  { %1755 = vsyncpa [#allocation4], 1 }

</bundles_post_ra>
